<compile_context>
chip_gen: v6e
topology: v6e:2x2x1
jax: 0.10.0
libtpu: 0.0.40
codegen_flags: <defaults>
</compile_context>

<pallas_src>
import functools

import jax
import jax.numpy as jnp
from jax.experimental import pallas as pl
from jax.experimental.pallas import tpu as pltpu

# ---------------- problem sizes (small, consistent with the module) --------
BOARD_SIZE = 8
ACTION_DIM = BOARD_SIZE ** 2          # 64  (one-hot action embedding width)
POLICY_DIM = BOARD_SIZE ** 4          # 4096 (policy head output)
EMBED_DIM = 32                        # cjepa_model.embed_dim (small)
BATCH = 8                             # fills all 8 sublanes / MXU rows
STATE_C, STATE_H, STATE_W = 4, 8, 8   # NCHW state
STATE_FLAT = STATE_C * STATE_H * STATE_W  # 256

LEAKY_SLOPE = 0.01                    # nn.LeakyReLU default
AUX_DIM = 128                         # fused lane-dense output: [emb | rew | val | pad]


# ---------------------------- Pallas kernel --------------------------------
def muzero_kernel(
    a_ref,        # (B,)              i32   SMEM  action indices
    x_ref,        # (B, STATE_FLAT)   f32   flattened NCHW state
    w_enc_ref,    # (STATE_FLAT, E)   f32
    b_enc_ref,    # (1, E)            f32
    w1s_ref,      # (E, E)            f32   dynamics Linear-1, state-embedding rows
    w1a_ref,      # (ACTION_DIM, E)   f32   dynamics Linear-1, action rows (gathered)
    b1_ref,       # (1, E)            f32
    w2_ref,       # (E, E)            f32
    b2_ref,       # (1, E)            f32
    w_pol_ref,    # (E, POLICY_DIM)   bf16  policy head (bf16 halves HBM traffic)
    b_pol_ref,    # (1, POLICY_DIM)   f32
    w_aux_ref,    # (E, AUX_DIM)      f32   [I_E | w_rew | w_val | 0]
    b_aux_ref,    # (1, AUX_DIM)      f32   [0   | b_rew | b_val | 0]
    pol_out_ref,  # (B, POLICY_DIM)   f32
    aux_out_ref,  # (B, AUX_DIM)      f32
):
    x = x_ref[...]
    B = x.shape[0]

    # ---- context encoder (stand-in Linear) ---------------------------------
    state_emb = (
        jnp.dot(x, w_enc_ref[...], preferred_element_type=jnp.float32)
        + b_enc_ref[...]
    )  # (B, E)

    # ---- action contribution ------------------------------------------------
    # one_hot(action) @ W1_action  ==  row gather of W1_action; do the gather
    # directly (dynamic sublane slice per batch row, index read from SMEM).
    act_rows = [w1a_ref[pl.ds(a_ref[b], 1), :] for b in range(B)]
    act_contrib = jnp.concatenate(act_rows, axis=0)              # (B, E)

    # ---- dynamics MLP: Linear -> LeakyReLU -> Linear ------------------------
    h = (
        jnp.dot(state_emb, w1s_ref[...], preferred_element_type=jnp.float32)
        + act_contrib
        + b1_ref[...]
    )
    h = jnp.where(h > 0, h, LEAKY_SLOPE * h)                     # LeakyReLU(0.01)
    next_emb = (
        jnp.dot(h, w2_ref[...], preferred_element_type=jnp.float32)
        + b2_ref[...]
    )                                                            # (B, E)

    # ---- fused lane-dense output: [next_emb | reward | value | zeros] -------
    aux_out_ref[...] = (
        jnp.dot(next_emb, w_aux_ref[...], preferred_element_type=jnp.float32)
        + b_aux_ref[...]
    )

    # ---- policy head (bf16 weights, f32 accumulate) --------------------------
    pol_out_ref[...] = (
        jnp.dot(next_emb.astype(jnp.bfloat16), w_pol_ref[...],
                preferred_element_type=jnp.float32)
        + b_pol_ref[...]
    )


# ------------------------------- parameters ---------------------------------
def init_params(key):
    ks = jax.random.split(key, 6)
    s = 0.02
    return {
        "w_enc": s * jax.random.normal(ks[0], (STATE_FLAT, EMBED_DIM), jnp.float32),
        "b_enc": jnp.zeros((1, EMBED_DIM), jnp.float32),
        "w_dyn1": s * jax.random.normal(ks[1], (EMBED_DIM + ACTION_DIM, EMBED_DIM), jnp.float32),
        "b_dyn1": 0.01 * jnp.ones((1, EMBED_DIM), jnp.float32),
        "w_dyn2": s * jax.random.normal(ks[2], (EMBED_DIM, EMBED_DIM), jnp.float32),
        "b_dyn2": 0.01 * jnp.ones((1, EMBED_DIM), jnp.float32),
        "w_rew": s * jax.random.normal(ks[3], (EMBED_DIM, 1), jnp.float32),
        "b_rew": jnp.zeros((1, 1), jnp.float32),
        "w_pol": s * jax.random.normal(ks[4], (EMBED_DIM, POLICY_DIM), jnp.float32),
        "b_pol": jnp.zeros((1, POLICY_DIM), jnp.float32),
        "w_val": s * jax.random.normal(ks[5], (EMBED_DIM, 1), jnp.float32),
        "b_val": jnp.zeros((1, 1), jnp.float32),
    }


def pack_params(params):
    """One-time conversion into the kernel's weight layout.

    - w_pol -> bf16 (dominant HBM->VMEM transfer: halves the bytes moved).
    - reward/value heads + the embedding passthrough are packed into a single
      lane-dense (E, 128) weight so the kernel emits one unmasked (B, 128) store.
    - dynamics Linear-1 weight split into state rows (MXU matmul) and action
      rows (SMEM-indexed gather).
    """
    w_aux = jnp.zeros((EMBED_DIM, AUX_DIM), jnp.float32)
    w_aux = w_aux.at[:, :EMBED_DIM].set(jnp.eye(EMBED_DIM, dtype=jnp.float32))
    w_aux = w_aux.at[:, EMBED_DIM].set(params["w_rew"][:, 0])
    w_aux = w_aux.at[:, EMBED_DIM + 1].set(params["w_val"][:, 0])
    b_aux = jnp.zeros((1, AUX_DIM), jnp.float32)
    b_aux = b_aux.at[0, EMBED_DIM].set(params["b_rew"][0, 0])
    b_aux = b_aux.at[0, EMBED_DIM + 1].set(params["b_val"][0, 0])
    return {
        "w_enc": params["w_enc"],
        "b_enc": params["b_enc"],
        "w_dyn1_s": params["w_dyn1"][:EMBED_DIM, :],
        "w_dyn1_a": params["w_dyn1"][EMBED_DIM:, :],
        "b_dyn1": params["b_dyn1"],
        "w_dyn2": params["w_dyn2"],
        "b_dyn2": params["b_dyn2"],
        "w_pol": params["w_pol"].astype(jnp.bfloat16),
        "b_pol": params["b_pol"],
        "w_aux": w_aux,
        "b_aux": b_aux,
    }


# ------------------------------- wrapper ------------------------------------
@functools.partial(jax.jit)
def muzero_agent_forward(state_nchw, action, kp):
    """Returns (next_state_embedding, reward, policy_logits, value)."""
    B = state_nchw.shape[0]
    x = state_nchw.reshape(B, -1).astype(jnp.float32)        # (B, C*H*W)
    a = action.astype(jnp.int32).reshape(B)                  # (B,)

    vmem = pl.BlockSpec(memory_space=pltpu.MemorySpace.VMEM)
    smem = pl.BlockSpec(memory_space=pltpu.MemorySpace.SMEM)

    args = (
        a, x,
        kp["w_enc"], kp["b_enc"],
        kp["w_dyn1_s"], kp["w_dyn1_a"], kp["b_dyn1"],
        kp["w_dyn2"], kp["b_dyn2"],
        kp["w_pol"], kp["b_pol"],
        kp["w_aux"], kp["b_aux"],
    )

    pol, aux = pl.pallas_call(
        muzero_kernel,
        out_shape=(
            jax.ShapeDtypeStruct((B, POLICY_DIM), jnp.float32),  # policy_logits
            jax.ShapeDtypeStruct((B, AUX_DIM), jnp.float32),     # [emb | rew | val | 0]
        ),
        in_specs=[smem] + [vmem] * (len(args) - 1),
        out_specs=(vmem, vmem),
        compiler_params=pltpu.CompilerParams(
            vmem_limit_bytes=8 * 1024 * 1024,
        ),
    )(*args)

    next_emb = aux[:, :EMBED_DIM]
    reward = aux[:, EMBED_DIM]
    value = aux[:, EMBED_DIM + 1]
    return next_emb, reward, pol, value


# ----------------------- pure-JAX reference (for checking) ------------------
def muzero_agent_reference(state_nchw, action, params):
    B = state_nchw.shape[0]
    x = state_nchw.reshape(B, -1).astype(jnp.float32)
    state_emb = x @ params["w_enc"] + params["b_enc"]
    action_emb = jax.nn.one_hot(action, ACTION_DIM, dtype=jnp.float32)
    sa = jnp.concatenate([state_emb, action_emb], axis=-1)
    h = sa @ params["w_dyn1"] + params["b_dyn1"]
    h = jnp.where(h > 0, h, LEAKY_SLOPE * h)
    next_emb = h @ params["w_dyn2"] + params["b_dyn2"]
    reward = (next_emb @ params["w_rew"] + params["b_rew"]).squeeze(-1)
    # kernel stores the policy weights as bf16; mirror that numerics here
    policy = (
        jnp.dot(next_emb.astype(jnp.bfloat16),
                params["w_pol"].astype(jnp.bfloat16),
                preferred_element_type=jnp.float32)
        + params["b_pol"]
    )
    value = (next_emb @ params["w_val"] + params["b_val"]).squeeze(-1)
    return next_emb, reward, policy, value


if __name__ == "__main__":
    key = jax.random.PRNGKey(0)
    k_state, k_action, k_params = jax.random.split(key, 3)

    state = jax.random.normal(
        k_state, (BATCH, STATE_C, STATE_H, STATE_W), jnp.float32
    )  # NCHW, like PyTorch
    action = jax.random.randint(k_action, (BATCH,), 0, ACTION_DIM, jnp.int32)
    params = init_params(k_params)
    kparams = pack_params(params)

    outs = muzero_agent_forward(state, action, kparams)
    outs = jax.block_until_ready(outs)

    refs = muzero_agent_reference(state, action, params)
    names = ("next_state_embedding", "reward", "policy_logits", "value")
    for name, o, r in zip(names, outs, refs):
        assert o.shape == r.shape, (name, o.shape, r.shape)
        assert jnp.allclose(o, r, atol=1e-3, rtol=1e-3), name

    print("KERNEL_OK")
</pallas_src>

<mosaic_0001>
module attributes {stable_mosaic.version = 11 : i64} {
  func.func @muzero_kernel(%arg0: memref<8xi32, #tpu.memory_space<smem>>, %arg1: memref<8x256xf32, #tpu.memory_space<vmem>>, %arg2: memref<256x32xf32, #tpu.memory_space<vmem>>, %arg3: memref<1x32xf32, #tpu.memory_space<vmem>>, %arg4: memref<32x32xf32, #tpu.memory_space<vmem>>, %arg5: memref<64x32xf32, #tpu.memory_space<vmem>>, %arg6: memref<1x32xf32, #tpu.memory_space<vmem>>, %arg7: memref<32x32xf32, #tpu.memory_space<vmem>>, %arg8: memref<1x32xf32, #tpu.memory_space<vmem>>, %arg9: memref<32x4096xbf16, #tpu.memory_space<vmem>>, %arg10: memref<1x4096xf32, #tpu.memory_space<vmem>>, %arg11: memref<32x128xf32, #tpu.memory_space<vmem>>, %arg12: memref<1x128xf32, #tpu.memory_space<vmem>>, %arg13: memref<8x4096xf32, #tpu.memory_space<vmem>>, %arg14: memref<8x128xf32, #tpu.memory_space<vmem>>) attributes {dimension_semantics = [], scalar_prefetch = 0 : i64, scratch_operands = 0 : i64, tpu.core_type = #tpu.core_type<tc>} {
    %c0 = arith.constant 0 : index
    %c0_0 = arith.constant 0 : index
    %0 = vector.load %arg1[%c0, %c0_0] : memref<8x256xf32, #tpu.memory_space<vmem>>, vector<8x256xf32>
    %c0_1 = arith.constant 0 : index
    %c0_2 = arith.constant 0 : index
    %1 = vector.load %arg2[%c0_1, %c0_2] : memref<256x32xf32, #tpu.memory_space<vmem>>, vector<256x32xf32>
    %cst = arith.constant dense<0.000000e+00> : vector<8x32xf32>
    %2 = tpu.matmul %0, %1, %cst {dimension_numbers = #tpu.dot_dimension_numbers<[1], [0], [0], [1], [0, 0, 1, 1], [], []>} : vector<8x256xf32>, vector<256x32xf32>, vector<8x32xf32> -> vector<8x32xf32>
    %c0_3 = arith.constant 0 : index
    %c0_4 = arith.constant 0 : index
    %3 = vector.load %arg3[%c0_3, %c0_4] : memref<1x32xf32, #tpu.memory_space<vmem>>, vector<1x32xf32>
    %4 = vector.broadcast %3 : vector<1x32xf32> to vector<8x32xf32>
    %5 = arith.addf %2, %4 : vector<8x32xf32>
    %c0_5 = arith.constant 0 : index
    %6 = memref.load %arg0[%c0_5] : memref<8xi32, #tpu.memory_space<smem>>
    %7 = arith.index_cast %6 : i32 to index
    %c0_6 = arith.constant 0 : index
    %8 = vector.load %arg5[%7, %c0_6] : memref<64x32xf32, #tpu.memory_space<vmem>>, vector<1x32xf32>
    %c1 = arith.constant 1 : index
    %9 = memref.load %arg0[%c1] : memref<8xi32, #tpu.memory_space<smem>>
    %10 = arith.index_cast %9 : i32 to index
    %c0_7 = arith.constant 0 : index
    %11 = vector.load %arg5[%10, %c0_7] : memref<64x32xf32, #tpu.memory_space<vmem>>, vector<1x32xf32>
    %c2 = arith.constant 2 : index
    %12 = memref.load %arg0[%c2] : memref<8xi32, #tpu.memory_space<smem>>
    %13 = arith.index_cast %12 : i32 to index
    %c0_8 = arith.constant 0 : index
    %14 = vector.load %arg5[%13, %c0_8] : memref<64x32xf32, #tpu.memory_space<vmem>>, vector<1x32xf32>
    %c3 = arith.constant 3 : index
    %15 = memref.load %arg0[%c3] : memref<8xi32, #tpu.memory_space<smem>>
    %16 = arith.index_cast %15 : i32 to index
    %c0_9 = arith.constant 0 : index
    %17 = vector.load %arg5[%16, %c0_9] : memref<64x32xf32, #tpu.memory_space<vmem>>, vector<1x32xf32>
    %c4 = arith.constant 4 : index
    %18 = memref.load %arg0[%c4] : memref<8xi32, #tpu.memory_space<smem>>
    %19 = arith.index_cast %18 : i32 to index
    %c0_10 = arith.constant 0 : index
    %20 = vector.load %arg5[%19, %c0_10] : memref<64x32xf32, #tpu.memory_space<vmem>>, vector<1x32xf32>
    %c5 = arith.constant 5 : index
    %21 = memref.load %arg0[%c5] : memref<8xi32, #tpu.memory_space<smem>>
    %22 = arith.index_cast %21 : i32 to index
    %c0_11 = arith.constant 0 : index
    %23 = vector.load %arg5[%22, %c0_11] : memref<64x32xf32, #tpu.memory_space<vmem>>, vector<1x32xf32>
    %c6 = arith.constant 6 : index
    %24 = memref.load %arg0[%c6] : memref<8xi32, #tpu.memory_space<smem>>
    %25 = arith.index_cast %24 : i32 to index
    %c0_12 = arith.constant 0 : index
    %26 = vector.load %arg5[%25, %c0_12] : memref<64x32xf32, #tpu.memory_space<vmem>>, vector<1x32xf32>
    %c7 = arith.constant 7 : index
    %27 = memref.load %arg0[%c7] : memref<8xi32, #tpu.memory_space<smem>>
    %28 = arith.index_cast %27 : i32 to index
    %c0_13 = arith.constant 0 : index
    %29 = vector.load %arg5[%28, %c0_13] : memref<64x32xf32, #tpu.memory_space<vmem>>, vector<1x32xf32>
    %30 = tpu.concatenate %8, %11, %14, %17, %20, %23, %26, %29 in 0 : vector<1x32xf32>, vector<1x32xf32>, vector<1x32xf32>, vector<1x32xf32>, vector<1x32xf32>, vector<1x32xf32>, vector<1x32xf32>, vector<1x32xf32> -> vector<8x32xf32>
    %c0_14 = arith.constant 0 : index
    %c0_15 = arith.constant 0 : index
    %31 = vector.load %arg4[%c0_14, %c0_15] : memref<32x32xf32, #tpu.memory_space<vmem>>, vector<32x32xf32>
    %cst_16 = arith.constant dense<0.000000e+00> : vector<8x32xf32>
    %32 = tpu.matmul %5, %31, %cst_16 {dimension_numbers = #tpu.dot_dimension_numbers<[1], [0], [0], [1], [0, 0, 1, 1], [], []>} : vector<8x32xf32>, vector<32x32xf32>, vector<8x32xf32> -> vector<8x32xf32>
    %33 = arith.addf %32, %30 : vector<8x32xf32>
    %c0_17 = arith.constant 0 : index
    %c0_18 = arith.constant 0 : index
    %34 = vector.load %arg6[%c0_17, %c0_18] : memref<1x32xf32, #tpu.memory_space<vmem>>, vector<1x32xf32>
    %35 = vector.broadcast %34 : vector<1x32xf32> to vector<8x32xf32>
    %36 = arith.addf %33, %35 : vector<8x32xf32>
    %cst_19 = arith.constant 0.000000e+00 : f32
    %37 = vector.broadcast %cst_19 : f32 to vector<8x32xf32>
    %38 = arith.cmpf ogt, %36, %37 : vector<8x32xf32>
    %cst_20 = arith.constant 0.00999999977 : f32
    %39 = vector.broadcast %cst_20 : f32 to vector<8x32xf32>
    %40 = arith.mulf %39, %36 : vector<8x32xf32>
    %41 = arith.select %38, %36, %40 : vector<8x32xi1>, vector<8x32xf32>
    %c0_21 = arith.constant 0 : index
    %c0_22 = arith.constant 0 : index
    %42 = vector.load %arg7[%c0_21, %c0_22] : memref<32x32xf32, #tpu.memory_space<vmem>>, vector<32x32xf32>
    %cst_23 = arith.constant dense<0.000000e+00> : vector<8x32xf32>
    %43 = tpu.matmul %41, %42, %cst_23 {dimension_numbers = #tpu.dot_dimension_numbers<[1], [0], [0], [1], [0, 0, 1, 1], [], []>} : vector<8x32xf32>, vector<32x32xf32>, vector<8x32xf32> -> vector<8x32xf32>
    %c0_24 = arith.constant 0 : index
    %c0_25 = arith.constant 0 : index
    %44 = vector.load %arg8[%c0_24, %c0_25] : memref<1x32xf32, #tpu.memory_space<vmem>>, vector<1x32xf32>
    %45 = vector.broadcast %44 : vector<1x32xf32> to vector<8x32xf32>
    %46 = arith.addf %43, %45 : vector<8x32xf32>
    %c0_26 = arith.constant 0 : index
    %c0_27 = arith.constant 0 : index
    %47 = vector.load %arg11[%c0_26, %c0_27] : memref<32x128xf32, #tpu.memory_space<vmem>>, vector<32x128xf32>
    %cst_28 = arith.constant dense<0.000000e+00> : vector<8x128xf32>
    %48 = tpu.matmul %46, %47, %cst_28 {dimension_numbers = #tpu.dot_dimension_numbers<[1], [0], [0], [1], [0, 0, 1, 1], [], []>} : vector<8x32xf32>, vector<32x128xf32>, vector<8x128xf32> -> vector<8x128xf32>
    %c0_29 = arith.constant 0 : index
    %c0_30 = arith.constant 0 : index
    %49 = vector.load %arg12[%c0_29, %c0_30] : memref<1x128xf32, #tpu.memory_space<vmem>>, vector<1x128xf32>
    %50 = vector.broadcast %49 : vector<1x128xf32> to vector<8x128xf32>
    %51 = arith.addf %48, %50 : vector<8x128xf32>
    %c0_31 = arith.constant 0 : index
    %c0_32 = arith.constant 0 : index
    %52 = vector.load %arg14[%c0_31, %c0_32] : memref<8x128xf32, #tpu.memory_space<vmem>>, vector<8x128xf32>
    tpu.vector_store %arg14[%c0_31, %c0_32], %51 {strides = array<i32>} : memref<8x128xf32, #tpu.memory_space<vmem>>, vector<8x128xf32>,
    %53 = arith.truncf %46 : vector<8x32xf32> to vector<8x32xbf16>
    %c0_33 = arith.constant 0 : index
    %c0_34 = arith.constant 0 : index
    %54 = vector.load %arg9[%c0_33, %c0_34] : memref<32x4096xbf16, #tpu.memory_space<vmem>>, vector<32x4096xbf16>
    %cst_35 = arith.constant dense<0.000000e+00> : vector<8x4096xf32>
    %55 = tpu.matmul %53, %54, %cst_35 {dimension_numbers = #tpu.dot_dimension_numbers<[1], [0], [0], [1], [0, 0, 1, 1], [], []>} : vector<8x32xbf16>, vector<32x4096xbf16>, vector<8x4096xf32> -> vector<8x4096xf32>
    %c0_36 = arith.constant 0 : index
    %c0_37 = arith.constant 0 : index
    %56 = vector.load %arg10[%c0_36, %c0_37] : memref<1x4096xf32, #tpu.memory_space<vmem>>, vector<1x4096xf32>
    %57 = vector.broadcast %56 : vector<1x4096xf32> to vector<8x4096xf32>
    %58 = arith.addf %55, %57 : vector<8x4096xf32>
    %c0_38 = arith.constant 0 : index
    %c0_39 = arith.constant 0 : index
    %59 = vector.load %arg13[%c0_38, %c0_39] : memref<8x4096xf32, #tpu.memory_space<vmem>>, vector<8x4096xf32>
    tpu.vector_store %arg13[%c0_38, %c0_39], %58 {strides = array<i32>} : memref<8x4096xf32, #tpu.memory_space<vmem>>, vector<8x4096xf32>,
    return
  }
}

</mosaic_0001>

<bundles_post_ra>
// kernel: muzero_agent_forward.1
= control target key start
LH: loop header
LB: loop body
LE: loop exit
PB: predicated region body
PF: predicated region fallthrough
CT: control target
= control target key end

     0   :  { %20 = vsyncpa [#allocation4], 0  ;;  %s2564_s0 = inlined_call_operand.vmem [shape: s32[8], index: 0, kind: input, shape index: {}]   ;;  %s2565_s1 = inlined_call_operand.vmem [shape: f32[8,256], index: 1, kind: input, shape index: {}]   ;;  %s2566_s2 = inlined_call_operand.vmem [shape: f32[256,32], index: 2, kind: input, shape index: {}]   ;;  %s2567_s3 = inlined_call_operand.vmem [shape: f32[1,32], index: 3, kind: input, shape index: {}]   ;;  %s2568_s4 = inlined_call_operand.vmem [shape: f32[32,32], index: 4, kind: input, shape index: {}]   ;;  %s2569_s5 = inlined_call_operand.vmem [shape: f32[64,32], index: 5, kind: input, shape index: {}]   ;;  %s2570_s6 = inlined_call_operand.vmem [shape: f32[1,32], index: 6, kind: input, shape index: {}]   ;;  %s2571_s7 = inlined_call_operand.vmem [shape: f32[32,32], index: 7, kind: input, shape index: {}]   ;;  %s2572_s8 = inlined_call_operand.vmem [shape: f32[1,32], index: 8, kind: input, shape index: {}]   ;;  %s2573_s9 = inlined_call_operand.vmem [shape: bf16[32,4096], index: 9, kind: input, shape index: {}]   ;;  %s2574_s10 = inlined_call_operand.vmem [shape: f32[1,4096], index: 10, kind: input, shape index: {}]   ;;  %s2575_s11 = inlined_call_operand.vmem [shape: f32[32,128], index: 11, kind: input, shape index: {}]   ;;  %s2576_s12 = inlined_call_operand.vmem [shape: f32[1,128], index: 12, kind: input, shape index: {}]   ;;  %s2577_s13 = inlined_call_operand.hbm [shape: f32[8,4096], index: 13, kind: output, shape index: {0}]   ;;  %s2578_s14 = inlined_call_operand.vmem [shape: f32[8,128], index: 14, kind: output, shape index: {1}]  }
   0x1   :  { %21 = vsyncpa [#allocation3], 0  ;;  %s28_s15 = sshll.u32 %s2564_s0, 4  ;;  %s29_s15 = int_to_ptr.vmem [resolvable:$true] %s28_s15 }
   0x2   :  { %s1942_s16 = scalar_lea.vmem %s29_s15, 16  ;;  %p1947_p1 = scmp.lt.s32.totalorder %s29_s15, %s29_s15 }
   0x3   :  { %p1943_p0 = scmp.ne.s32.totalorder %s29_s15, %s1942_s16  ;;  %p1948_p2 = scmp.lt.s32.totalorder %s1942_s16, %s1942_s16 }
   0x5   :  { %p1949_p3 = por %p1948_p2, %p1947_p1 }
   0x7   :  { %p1950_p4 = pnand %p1949_p3, %p1943_p0 }
   0x9   :  { %1953 = shalt.err (!%p1950_p4)
}
   0xa   :  { %s1978_s17 = smov [#allocation2]  }
   0xb   :  { %31 = dma.vmem_to_smem %s29_s15, 16, %s1978_s17, [#allocation4]  }
   0xc   :  { %1974 = dma.done.wait [#allocation4], 16  }
   0xd   :  { %1975 = vsyncadd [#allocation4], 4294967280 }
   0xe   :  { %59 = sfence }
   0xf   :  { %v94_v0 = vld [vmem:[%s2566_s2 + $0xf8] sm:$0xff]  ;;  %v93_v2 = vld [vmem:[%s2566_s2 + $0xf0] sm:$0xff]  ;;  %v1979_v4 = vmov 0.0   ;;  %v92_v5 = vld [vmem:[%s2566_s2 + $0xe8] sm:$0xff]  ;;  %vm1980_vm0 = vmmov 0   ;;  %vm235_vm1 = vcmask 261120  }
  0x10   :  { %v78_v1 = vld [vmem:[%s2566_s2 + $0x78] sm:$0xff]  ;;  %1854 = vmatprep.subr.mxu0 %v94_v0  ;;  %v77_v3 = vld [vmem:[%s2566_s2 + $0x70] sm:$0xff]  ;;  %1904 = vmatprep.subr.mxu1 %v1979_v4  ;;  %v76_v6 = vld [vmem:[%s2566_s2 + $0x68] sm:$0xff]  ;;  %s1761_s19 = sld [smem:[#allocation2 + $0x1]]  ;;  %vm217_vm2 = vcmask 1040384   ;;  %vm219_vm3 = vcmask 1041408  }
  0x11   :  { %1855 = vmatpush3.msra.mxu0 %v78_v1  ;;  %v91_v7 = vld [vmem:[%s2566_s2 + $0xe0] sm:$0xff]  ;;  %v90_v9 = vld [vmem:[%s2566_s2 + $0xd8] sm:$0xff]  ;;  %v89_v11 = vld [vmem:[%s2566_s2 + $0xd0] sm:$0xff]  ;;  %1912 = vmatprep.mubr.msk.f32.mxu1 %vm1980_vm0, %v1979_v4  ;;  %s1762_s20 = sld [smem:[#allocation2 + $0x2]]  ;;  %vm221_vm4 = vcmask 1042432   ;;  %vm223_vm5 = vcmask 1043456  }
  0x12   :  { %1856 = vmatprep.subr.mxu0 %v93_v2  ;;  %v75_v8 = vld [vmem:[%s2566_s2 + $0x60] sm:$0xff]  ;;  %v74_v10 = vld [vmem:[%s2566_s2 + $0x58] sm:$0xff]  ;;  %v73_v12 = vld [vmem:[%s2566_s2 + $0x50] sm:$0xff]  ;;  %s1763_s21 = sld [smem:[#allocation2 + $0x3]]  ;;  %vm225_vm6 = vcmask 1044480   ;;  %vm227_vm7 = vcmask 1045504  }
  0x13   :  { %1857 = vmatpush3.msra.mxu0 %v77_v3  ;;  %v88_v13 = vld [vmem:[%s2566_s2 + $0xc8] sm:$0xff]  ;;  %v87_v16 = vld [vmem:[%s2566_s2 + $0xc0] sm:$0xff]  ;;  %v86_v18 = vld [vmem:[%s2566_s2 + $0xb8] sm:$0xff]  ;;  %s1764_s22 = sld [smem:[#allocation2 + $0x4]]  ;;  %vm229_vm8 = vcmask 1046528  }
  0x14   :  { %1858 = vmatprep.subr.mxu0 %v92_v5  ;;  %v62_v14 = vld [vmem:[%s2565_s1 + $0x8] sm:$0xff]  ;;  %v71_v17 = vld [vmem:[%s2566_s2 + $0x40] sm:$0xff]  ;;  %v70_v19 = vld [vmem:[%s2566_s2 + $0x38] sm:$0xff]  ;;  %s1766_s15 = sld [smem:[#allocation2 + $0x6]] }
  0x15   :  { %1859 = vmatpush3.msra.mxu0 %v76_v6  ;;  %v72_v15 = vld [vmem:[%s2566_s2 + $0x48] sm:$0xff]  ;;  %166 = vmatprep.mubr.f32.mxu0 %v62_v14  ;;  %v85_v20 = vld [vmem:[%s2566_s2 + $0xb0] sm:$0xff]  ;;  %v83_v24 = vld [vmem:[%s2566_s2 + $0xa0] sm:$0xff] }
  0x16   :  { %1860 = vmatprep.subr.mxu0 %v91_v7  ;;  %v69_v21 = vld [vmem:[%s2566_s2 + $0x30] sm:$0xff]  ;;  %v84_v22 = vld [vmem:[%s2566_s2 + $0xa8] sm:$0xff]  ;;  %v67_v25 = vld [vmem:[%s2566_s2 + $0x20] sm:$0xff] }
  0x17   :  { %1861 = vmatpush3.msra.mxu0 %v75_v8  ;;  %v68_v23 = vld [vmem:[%s2566_s2 + $0x28] sm:$0xff]  ;;  %v82_v26 = vld [vmem:[%s2566_s2 + $0x98] sm:$0xff]  ;;  %v81_v28 = vld [vmem:[%s2566_s2 + $0x90] sm:$0xff] }
  0x18   :  { %1862 = vmatprep.subr.mxu0 %v90_v9  ;;  %v66_v27 = vld [vmem:[%s2566_s2 + $0x18] sm:$0xff]  ;;  %v65_v29 = vld [vmem:[%s2566_s2 + $0x10] sm:$0xff]  ;;  %v80_v30 = vld [vmem:[%s2566_s2 + $0x88] sm:$0xff]  ;;  %s182_s30 = scalar_lea.vmem %s2569_s5, %s1763_s21 }
  0x19   :  { %1863 = vmatpush3.msra.mxu0 %v74_v10  ;;  %v64_v31 = vld [vmem:[%s2566_s2 + $0x8] sm:$0xff]  ;;  %v79_v32 = vld [vmem:[%s2566_s2 + $0x80] sm:$0xff]  ;;  %v234_v35 = vld [vmem:[%s2568_s4 + $0x18] sm:$0xff]  ;;  %s185_s18 = scalar_lea.vmem %s2569_s5, %s1764_s22 }
  0x1a   :  { %1864 = vmatprep.subr.mxu0 %v89_v11  ;;  %v63_v33 = vld [vmem:[%s2566_s2] sm:$0xff]  ;;  %1905 = vmatpush3.msra.mxu1 %v234_v35  ;;  %v233_v36 = vld [vmem:[%s2568_s4 + $0x10] sm:$0xff]  ;;  %v232_v37 = vld [vmem:[%s2568_s4 + $0x8] sm:$0xff] }
  0x1b   :  { %1865 = vmatpush3.msra.mxu0 %v73_v12  ;;  %v61_v34 = vld [vmem:[%s2565_s1] sm:$0xff]  ;;  %1906 = vmatprep.subr.mxu1 %v1979_v4  ;;  %v323_v44 = vld [vmem:[%s2571_s7 + $0x18] sm:$0xff]  ;;  %v322_v45 = vld [vmem:[%s2571_s7 + $0x10] sm:$0xff]  ;;  %s176_s1 = scalar_lea.vmem %s2569_s5, %s1761_s19  ;;  %s1767_s19 = sld [smem:[#allocation2 + $0x7]] }
  0x1c   :  { %1866 = vmatprep.subr.mxu0 %v88_v13  ;;  %1907 = vmatpush3.msra.mxu1 %v233_v36  ;;  %v231_v38 = vld [vmem:[%s2568_s4] sm:$0xff]  ;;  %v321_v46 = vld [vmem:[%s2571_s7 + $0x8] sm:$0xff]  ;;  %s179_s4 = scalar_lea.vmem %s2569_s5, %s1762_s20 }
  0x1d   :  { %1867 = vmatpush3.msra.mxu0 %v72_v15  ;;  %1908 = vmatprep.subr.mxu1 %v1979_v4  ;;  %v1760_v40 = vld [vmem:[%s2567_s3] ss:$0 sm:$0xff]  ;;  %v523_v48 = vld [vmem:[%s2573_s9 + $0x108] sm:$0xff]  ;;  %s1765_s3 = sld [smem:[#allocation2 + $0x5]] }
  0x1e   :  { %1868 = vmatprep.subr.mxu0 %v87_v16  ;;  %1909 = vmatpush3.msra.mxu1 %v232_v37  ;;  %v320_v47 = vld [vmem:[%s2571_s7] sm:$0xff]  ;;  %v539_v49 = vld [vmem:[%s2573_s9 + $0x188] sm:$0xff]  ;;  %s172_s7 = sld [smem:[#allocation2]] }
  0x1f   :  { %1869 = vmatpush3.msra.mxu0 %v71_v17  ;;  %1910 = vmatprep.subr.mxu1 %v1979_v4  ;;  %v1808_v50 = vcombine.low %v523_v48, %v539_v49  ;;  %v1809_v51 = vcombine.high %v523_v48, %v539_v49  ;;  %v177_v52 = vld [vmem:[%s176_s1] sm:$0x1]  ;;  %s191_s1 = scalar_lea.vmem %s2569_s5, %s1766_s15  ;;  %v407_v17 = vld [vmem:[%s2575_s11 + $0x18] sm:$0xff]  ;;  %v527_v48 = vld [vmem:[%s2573_s9 + $0x128] sm:$0xff] }
  0x20   :  { %1870 = vmatprep.subr.mxu0 %v86_v18  ;;  %1911 = vmatpush3.msra.mxu1 %v231_v38  ;;  %v180_v53 = vld [vmem:[%s179_s4] sm:$0x1]  ;;  %v197_v54 = vrot.slane %v177_v52, 7  ;;  %v493_v38 = vld [vmem:[%s2573_s9 + $0x18] sm:$0xff]  ;;  %v543_v49 = vld [vmem:[%s2573_s9 + $0x1a8] sm:$0xff] }
  0x21   :  { %1871 = vmatpush3.msra.mxu0 %v70_v19  ;;  %1915 = vmatprep.subr.mxu1 %v1979_v4  ;;  %v183_v56 = vld [vmem:[%s182_s30] sm:$0x1]  ;;  %v200_v57 = vrot.slane %v180_v53, 6  ;;  %s194_s24 = scalar_lea.vmem %s2569_s5, %s1767_s19  ;;  %v406_v19 = vld [vmem:[%s2575_s11 + $0x10] sm:$0xff] }
  0x22   :  { %1872 = vmatprep.subr.mxu0 %v85_v20  ;;  %v186_v59 = vld [vmem:[%s185_s18] sm:$0x1]  ;;  %v203_v60 = vrot.slane %v183_v56, 5  ;;  %v405_v20 = vld [vmem:[%s2575_s11 + $0x8] sm:$0xff]  ;;  %v492_v52 = vld [vmem:[%s2573_s9 + $0x10] sm:$0xff] }
  0x23   :  { %1873 = vmatpush3.msra.mxu0 %v69_v21  ;;  %s188_s2 = scalar_lea.vmem %s2569_s5, %s1765_s3  ;;  %v206_v63 = vrot.slane %v186_v59, 4  ;;  %v192_v1 = vld [vmem:[%s191_s1] sm:$0x1]  ;;  %v491_v21 = vld [vmem:[%s2573_s9 + $0x8] sm:$0xff]  ;;  %v508_v53 = vld [vmem:[%s2573_s9 + $0x90] sm:$0xff]  ;;  %v1816_v59 = vcombine.low %v527_v48, %v543_v49 }
  0x24   :  { %1874 = vmatprep.subr.mxu0 %v84_v22  ;;  %s173_s27 = scalar_lea.vmem %s2569_s5, %s172_s7  ;;  %v189_v62 = vld [vmem:[%s188_s2] sm:$0x1]  ;;  %v212_v6 = vrot.slane %v192_v1, 2  ;;  %v507_v22 = vld [vmem:[%s2573_s9 + $0x88] sm:$0xff]  ;;  %v545_v1 = vld [vmem:[%s2573_s9 + $0x1b8] sm:$0xff] }
  0x25   :  { %1875 = vmatpush3.msra.mxu0 %v68_v23  ;;  %v174_v55 = vld [vmem:[%s173_s27] sm:$0x1]  ;;  %v209_v2 = vrot.slane %v189_v62, 3  ;;  %v1777_v23 = vcombine.high %v491_v21, %v507_v22  ;;  %v495_v56 = vld [vmem:[%s2573_s9 + $0x28] sm:$0xff] }
  0x26   :  { %1876 = vmatprep.subr.mxu0 %v83_v24  ;;  %v218_v58 = vsel %vm217_vm2, %v174_v55, %v197_v54  ;;  %v195_v5 = vld [vmem:[%s194_s24] sm:$0x1]  ;;  %v1817_v54 = vcombine.high %v527_v48, %v543_v49 }
  0x27   :  { %1877 = vmatpush3.msra.mxu0 %v67_v25  ;;  %v220_v61 = vsel %vm219_vm3, %v218_v58, %v200_v57  ;;  %v215_v8 = vrot.slane %v195_v5, 1  ;;  %v1769_v12 = vld [vmem:[%s2570_s6] ss:$0 sm:$0xff]  ;;  %v511_v57 = vld [vmem:[%s2573_s9 + $0xa8] sm:$0xff]  ;;  %v1779_v58 = vcombine.high %v492_v52, %v508_v53 }
  0x28   :  { %1878 = vmatprep.subr.mxu0 %v82_v26  ;;  %v222_v0 = vsel %vm221_vm4, %v220_v61, %v203_v60  ;;  %v522_v24 = vld [vmem:[%s2573_s9 + $0x100] sm:$0xff]  ;;  %v1776_v26 = vcombine.low %v491_v21, %v507_v22  ;;  %v1785_v62 = vcombine.high %v495_v56, %v511_v57  ;;  %v496_v21 = vld [vmem:[%s2573_s9 + $0x30] sm:$0xff] }
  0x29   :  { %1879 = vmatpush3.msra.mxu0 %v66_v27  ;;  %v224_v3 = vsel %vm223_vm5, %v222_v0, %v206_v63  ;;  %v538_v25 = vld [vmem:[%s2573_s9 + $0x180] sm:$0xff]  ;;  %v1778_v63 = vcombine.low %v492_v52, %v508_v53  ;;  %v529_v0 = vld [vmem:[%s2573_s9 + $0x138] sm:$0xff]  ;;  %v512_v22 = vld [vmem:[%s2573_s9 + $0xb0] sm:$0xff] }
  0x2a   :  { %1880 = vmatprep.subr.mxu0 %v81_v28  ;;  %v226_v7 = vsel %vm225_vm6, %v224_v3, %v209_v2  ;;  %v1807_v27 = vcombine.high %v522_v24, %v538_v25  ;;  %v1806_v28 = vcombine.low %v522_v24, %v538_v25  ;;  %v490_v35 = vld [vmem:[%s2573_s9] sm:$0xff]  ;;  %v1784_v3 = vcombine.low %v495_v56, %v511_v57  ;;  %v499_v25 = vld [vmem:[%s2573_s9 + $0x48] sm:$0xff] }
  0x2b   :  { %1881 = vmatpush3.msra.mxu0 %v65_v29  ;;  %v228_v9 = vsel %vm227_vm7, %v226_v7, %v212_v6  ;;  %v525_v29 = vld [vmem:[%s2573_s9 + $0x118] sm:$0xff]  ;;  %v506_v36 = vld [vmem:[%s2573_s9 + $0x80] sm:$0xff]  ;;  %v1821_v7 = vcombine.high %v529_v0, %v545_v1 }
  0x2c   :  { %1882 = vmatprep.subr.mxu0 %v80_v30  ;;  %v230_v10 = vsel %vm229_vm8, %v228_v9, %v215_v8  ;;  %v541_v30 = vld [vmem:[%s2573_s9 + $0x198] sm:$0xff]  ;;  %v526_v60 = vld [vmem:[%s2573_s9 + $0x120] sm:$0xff] }
  0x2d   :  { %1883 = vmatpush3.msra.mxu0 %v64_v31  ;;  %v1813_v31 = vcombine.high %v525_v29, %v541_v30  ;;  %v542_v61 = vld [vmem:[%s2573_s9 + $0x1a0] sm:$0xff]  ;;  %v497_v9 = vld [vmem:[%s2573_s9 + $0x38] sm:$0xff] }
  0x2e   :  { %1884 = vmatprep.subr.mxu0 %v79_v32  ;;  %v1981_v32 = vmov 0   ;;  %v1815_v2 = vcombine.high %v526_v60, %v542_v61  ;;  %v494_v5 = vld [vmem:[%s2573_s9 + $0x20] sm:$0xff]  ;;  %v1814_v8 = vcombine.low %v526_v60, %v542_v61 }
  0x2f   :  { %1885 = vmatpush3.msra.mxu0 %v63_v33  ;;  %v1812_v33 = vcombine.low %v525_v29, %v541_v30  ;;  %v510_v6 = vld [vmem:[%s2573_s9 + $0xa0] sm:$0xff] }
  0x30   :  { %167 = vmatmul.mubr.f32.vlgmr.msra.gmra.mxu0 %v61_v34  ;;  %1098 = vmatprep.subr.bf16.mxu0 %v1809_v51  ;;  %v1770_v34 = vld [vmem:[%s2572_s8] ss:$0 sm:$0xff] }
  0x31   :  { %1099 = vmatpush1.bf16.msra.mxu0 %v1808_v50  ;;  %1118 = vmatprep.mubr.bf16.mxu0 %v1981_v32  ;;  %v546_v29 = vld [vmem:[%s2573_s9 + $0x1c0] sm:$0xff] }
  0x32   :  { %1100 = vmatprep.subr.bf16.mxu0 %v1777_v23 }
  0x35   :  { %1101 = vmatpush1.bf16.msra.mxu0 %v1776_v26  ;;  %v1787_v26 = vcombine.high %v496_v21, %v512_v22 }
  0x36   :  { %1180 = vmatprep.subr.bf16.mxu0 %v1813_v31  ;;  %v1786_v31 = vcombine.low %v496_v21, %v512_v22  ;;  %v504_v21 = vld [vmem:[%s2573_s9 + $0x70] sm:$0xff] }
  0x37   :  { %v520_v22 = vld [vmem:[%s2573_s9 + $0xf0] sm:$0xff] }
  0xf0   :  { %v1886_v39 = vpop.f32.mrf.mxu0 }
  0xf2   :  { %v1887_v41 = vpop.f32.mrf.mxu0 }
  0xf3   :  { %v1888_v42 = vadd.f32 %v1887_v41, %v1886_v39  ;;  %v509_v39 = vld [vmem:[%s2573_s9 + $0x98] sm:$0xff]  ;;  %v1775_v41 = vcombine.high %v490_v35, %v506_v36 }
  0xf4   :  { %v1780_v51 = vcombine.low %v493_v38, %v509_v39 }
  0xf5   :  { %v169_v43 = vadd.f32 %v1888_v42, %v1760_v40 }
  0xf7   :  { %1913 = vmatmul.mubr.msk.f32.vlgmr.msra.gmra.mxu1 %vm235_vm1, %v169_v43  ;;  %v524_v43 = vld [vmem:[%s2573_s9 + $0x110] sm:$0xff] }
  0xf8   :  { %1923 = vmatprep.mubr.msk.f32.mxu1 %vm1980_vm0, %v1979_v4  ;;  %1916 = vmatpush3.msra.mxu1 %v323_v44  ;;  %v540_v44 = vld [vmem:[%s2573_s9 + $0x190] sm:$0xff] }
  0xf9   :  { %1917 = vmatprep.subr.mxu1 %v1979_v4  ;;  %v1811_v50 = vcombine.high %v524_v43, %v540_v44  ;;  %v1810_v55 = vcombine.low %v524_v43, %v540_v44 }
  0xfa   :  { %1918 = vmatpush3.msra.mxu1 %v322_v45 }
  0xfb   :  { %1919 = vmatprep.subr.mxu1 %v1979_v4 }
  0xfc   :  { %1920 = vmatpush3.msra.mxu1 %v321_v46  ;;  %v1781_v46 = vcombine.high %v493_v38, %v509_v39  ;;  %v514_v38 = vld [vmem:[%s2573_s9 + $0xc0] sm:$0xff] }
  0xfd   :  { %1921 = vmatprep.subr.mxu1 %v1979_v4 }
  0xfe   :  { %1922 = vmatpush3.msra.mxu1 %v320_v47  ;;  %v1774_v47 = vcombine.low %v490_v35, %v506_v36 }
  0xff   :  { %1926 = vmatprep.subr.mxu1 %v1979_v4 }
 0x1b7   :  { %v305_v11 = vpop.f32.mrf.mxu1 }
 0x1b8   :  { %v306_v13 = vadd.f32 %v305_v11, %v230_v10  ;;  %v513_v10 = vld [vmem:[%s2573_s9 + $0xb8] sm:$0xff]  ;;  %v1783_v11 = vcombine.high %v494_v5, %v510_v6 }
 0x1b9   :  { %v1914_v14 = vpop.f32.mrf.mxu1 }
 0x1ba   :  { %v316_v15 = vadd.f32 %v1769_v12, %v306_v13  ;;  %v1820_v12 = vcombine.low %v529_v0, %v545_v1  ;;  %v528_v13 = vld [vmem:[%s2573_s9 + $0x130] sm:$0xff] }
 0x1bb   :  { %v544_v14 = vld [vmem:[%s2573_s9 + $0x1b0] sm:$0xff] }
 0x1bc   :  { %vm317_vm9 = vcmp.gt.f32.partialorder %v316_v15, 0.0  ;;  %v318_v16 = vmul.f32 0.01, %v316_v15  ;;  %v1818_v24 = vcombine.low %v528_v13, %v544_v14 }
 0x1be   :  { %v319_v18 = vsel %vm317_vm9, %v316_v15, %v318_v16  ;;  %v1789_v15 = vcombine.high %v497_v9, %v513_v10  ;;  %v1782_v16 = vcombine.low %v494_v5, %v510_v6 }
 0x1bf   :  { %1924 = vmatmul.mubr.msk.f32.vlgmr.msra.gmra.mxu1 %vm235_vm1, %v319_v18  ;;  %v547_v18 = vld [vmem:[%s2573_s9 + $0x1c8] sm:$0xff] }
 0x1c0   :  { %1927 = vmatpush3.msra.mxu1 %v407_v17  ;;  %1934 = vmatprep.mubr.msk.f32.mxu1 %vm1980_vm0, %v1979_v4  ;;  %v531_v17 = vld [vmem:[%s2573_s9 + $0x148] sm:$0xff] }
 0x1c1   :  { %1928 = vmatprep.subr.mxu1 %v1979_v4  ;;  %v1825_v23 = vcombine.high %v531_v17, %v547_v18 }
 0x1c2   :  { %1929 = vmatpush3.msra.mxu1 %v406_v19  ;;  %v1819_v19 = vcombine.high %v528_v13, %v544_v14 }
 0x1c3   :  { %1930 = vmatprep.subr.mxu1 %v1979_v4 }
 0x1c4   :  { %1931 = vmatpush3.msra.mxu1 %v405_v20  ;;  %v1788_v20 = vcombine.low %v497_v9, %v513_v10 }
 0x1c5   :  { %1932 = vmatprep.subr.mxu1 %v1979_v4  ;;  %v404_v4 = vld [vmem:[%s2575_s11] sm:$0xff] }
 0x1c6   :  { %1933 = vmatpush3.msra.mxu1 %v404_v4  ;;  %v515_v4 = vld [vmem:[%s2573_s9 + $0xc8] sm:$0xff] }
 0x1c7   :  { %1057 = vmatprep.subr.bf16.mxu1 %v1807_v27  ;;  %v1824_v27 = vcombine.low %v531_v17, %v547_v18  ;;  %v1793_v30 = vcombine.high %v499_v25, %v515_v4  ;;  %v1792_v36 = vcombine.low %v499_v25, %v515_v4  ;;  %v1802_v25 = vcombine.low %v504_v21, %v520_v22 }
 0x1c8   :  { %v562_v4 = vlaneseq }
 0x27f   :  { %v400_v37 = vpop.f32.mrf.mxu1 }
 0x280   :  { %v401_v40 = vadd.f32 %v1770_v34, %v400_v37  ;;  %v549_v34 = vld [vmem:[%s2573_s9 + $0x1d8] sm:$0xff]  ;;  %v498_v37 = vld [vmem:[%s2573_s9 + $0x40] sm:$0xff] }
 0x281   :  { %v1925_v42 = vpop.f32.mrf.mxu1  ;;  %v1791_v43 = vcombine.high %v498_v37, %v514_v38  ;;  %v1790_v49 = vcombine.low %v498_v37, %v514_v38 }
 0x282   :  { %v2295_v45 = vpack.c.bf16 %v401_v40, %v401_v40  ;;  %1935 = vmatmul.mubr.msk.f32.vlgmr.msra.gmra.mxu1 %vm235_vm1, %v401_v40  ;;  %v517_v42 = vld [vmem:[%s2573_s9 + $0xd8] sm:$0xff] }
 0x283   :  { %1058 = vmatpush1.bf16.msra.mxu1 %v1806_v28  ;;  %1077 = vmatprep.mubr.bf16.mxu1 %v1981_v32  ;;  %v530_v28 = vld [vmem:[%s2573_s9 + $0x140] sm:$0xff] }
 0x284   :  { %1839 = vmatmul.mubr.msk.bf16.vlgmr.msra.gmra.mxu0 %vm235_vm1, %v2295_v45  ;;  %1059 = vmatprep.subr.bf16.mxu1 %v1775_v41  ;;  %v1823_v35 = vcombine.high %v530_v28, %v546_v29  ;;  %v1822_v40 = vcombine.low %v530_v28, %v546_v29  ;;  %v501_v41 = vld [vmem:[%s2573_s9 + $0x58] sm:$0xff]  ;;  %v554_v28 = vld [vmem:[%s2574_s10] sm:$0xff] }
 0x285   :  { %1181 = vmatpush1.bf16.msra.mxu0 %v1812_v33  ;;  %1200 = vmatprep.mubr.bf16.mxu0 %v1981_v32  ;;  %v533_v33 = vld [vmem:[%s2573_s9 + $0x158] sm:$0xff]  ;;  %v1797_v48 = vcombine.high %v501_v41, %v517_v42  ;;  %v1796_v53 = vcombine.low %v501_v41, %v517_v42 }
 0x286   :  { %1182 = vmatprep.subr.bf16.mxu0 %v1781_v46  ;;  %v1829_v39 = vcombine.high %v533_v33, %v549_v34  ;;  %v1828_v44 = vcombine.low %v533_v33, %v549_v34  ;;  %v532_v46 = vld [vmem:[%s2573_s9 + $0x150] sm:$0xff] }
 0x287   :  { %1060 = vmatpush1.bf16.msra.mxu1 %v1774_v47  ;;  %v548_v47 = vld [vmem:[%s2573_s9 + $0x1d0] sm:$0xff] }
 0x288   :  { %1139 = vmatprep.subr.bf16.mxu1 %v1811_v50  ;;  %v535_v50 = vld [vmem:[%s2573_s9 + $0x168] sm:$0xff]  ;;  %v1827_v52 = vcombine.high %v532_v46, %v548_v47  ;;  %v1826_v57 = vcombine.low %v532_v46, %v548_v47 }
 0x289   :  { %1183 = vmatpush1.bf16.msra.mxu0 %v1780_v51  ;;  %v551_v51 = vld [vmem:[%s2573_s9 + $0x1e8] sm:$0xff] }
 0x28a   :  { %1838 = vmatmul.mubr.msk.bf16.vlgmr.msra.gmra.mxu1 %vm235_vm1, %v2295_v45  ;;  %1262 = vmatprep.subr.bf16.mxu0 %v1817_v54  ;;  %v500_v54 = vld [vmem:[%s2573_s9 + $0x50] sm:$0xff]  ;;  %v1833_v56 = vcombine.high %v535_v50, %v551_v51  ;;  %v1832_v61 = vcombine.low %v535_v50, %v551_v51 }
 0x28b   :  { %1140 = vmatpush1.bf16.msra.mxu1 %v1810_v55  ;;  %1159 = vmatprep.mubr.bf16.mxu1 %v1981_v32  ;;  %v516_v55 = vld [vmem:[%s2573_s9 + $0xd0] sm:$0xff] }
 0x28c   :  { %1841 = vmatmul.mubr.msk.bf16.vlgmr.msra.gmra.mxu0 %vm235_vm1, %v2295_v45  ;;  %1141 = vmatprep.subr.bf16.mxu1 %v1779_v58  ;;  %v503_v58 = vld [vmem:[%s2573_s9 + $0x68] sm:$0xff]  ;;  %v1795_v60 = vcombine.high %v500_v54, %v516_v55  ;;  %v1794_v1 = vcombine.low %v500_v54, %v516_v55 }
 0x28d   :  { %1263 = vmatpush1.bf16.msra.mxu0 %v1816_v59  ;;  %1282 = vmatprep.mubr.bf16.mxu0 %v1981_v32  ;;  %v519_v59 = vld [vmem:[%s2573_s9 + $0xe8] sm:$0xff] }
 0x28e   :  { %1264 = vmatprep.subr.bf16.mxu0 %v1785_v62  ;;  %v534_v62 = vld [vmem:[%s2573_s9 + $0x160] sm:$0xff]  ;;  %v1801_v0 = vcombine.high %v503_v58, %v519_v59  ;;  %v1800_v6 = vcombine.low %v503_v58, %v519_v59 }
 0x28f   :  { %1142 = vmatpush1.bf16.msra.mxu1 %v1778_v63  ;;  %v550_v63 = vld [vmem:[%s2573_s9 + $0x1e0] sm:$0xff] }
 0x290   :  { %1221 = vmatprep.subr.bf16.mxu1 %v1815_v2  ;;  %v537_v2 = vld [vmem:[%s2573_s9 + $0x178] sm:$0xff]  ;;  %v1831_v5 = vcombine.high %v534_v62, %v550_v63  ;;  %v1830_v10 = vcombine.low %v534_v62, %v550_v63 }
 0x291   :  { %1265 = vmatpush1.bf16.msra.mxu0 %v1784_v3  ;;  %v553_v3 = vld [vmem:[%s2573_s9 + $0x1f8] sm:$0xff] }
 0x292   :  { %1840 = vmatmul.mubr.msk.bf16.vlgmr.msra.gmra.mxu1 %vm235_vm1, %v2295_v45  ;;  %1344 = vmatprep.subr.bf16.mxu0 %v1821_v7  ;;  %v502_v7 = vld [vmem:[%s2573_s9 + $0x60] sm:$0xff]  ;;  %v1837_v9 = vcombine.high %v537_v2, %v553_v3  ;;  %v1836_v14 = vcombine.low %v537_v2, %v553_v3 }
 0x293   :  { %1222 = vmatpush1.bf16.msra.mxu1 %v1814_v8  ;;  %1241 = vmatprep.mubr.bf16.mxu1 %v1981_v32  ;;  %v518_v8 = vld [vmem:[%s2573_s9 + $0xe0] sm:$0xff] }
 0x294   :  { %1843 = vmatmul.mubr.msk.bf16.vlgmr.msra.gmra.mxu0 %vm235_vm1, %v2295_v45  ;;  %1223 = vmatprep.subr.bf16.mxu1 %v1783_v11  ;;  %v505_v11 = vld [vmem:[%s2573_s9 + $0x78] sm:$0xff]  ;;  %v1799_v13 = vcombine.high %v502_v7, %v518_v8  ;;  %v1798_v18 = vcombine.low %v502_v7, %v518_v8 }
 0x295   :  { %1345 = vmatpush1.bf16.msra.mxu0 %v1820_v12  ;;  %1364 = vmatprep.mubr.bf16.mxu0 %v1981_v32  ;;  %v521_v12 = vld [vmem:[%s2573_s9 + $0xf8] sm:$0xff] }
 0x296   :  { %1346 = vmatprep.subr.bf16.mxu0 %v1789_v15  ;;  %v536_v15 = vld [vmem:[%s2573_s9 + $0x170] sm:$0xff]  ;;  %v1805_v17 = vcombine.high %v505_v11, %v521_v12 }
 0x297   :  { %1224 = vmatpush1.bf16.msra.mxu1 %v1782_v16  ;;  %v552_v16 = vld [vmem:[%s2573_s9 + $0x1f0] sm:$0xff] }
 0x298   :  { %1303 = vmatprep.subr.bf16.mxu1 %v1819_v19  ;;  %v1835_v19 = vcombine.high %v536_v15, %v552_v16 }
 0x299   :  { %1347 = vmatpush1.bf16.msra.mxu0 %v1788_v20  ;;  %v1804_v20 = vcombine.low %v505_v11, %v521_v12 }
 0x29a   :  { %1842 = vmatmul.mubr.msk.bf16.vlgmr.msra.gmra.mxu1 %vm235_vm1, %v2295_v45  ;;  %1426 = vmatprep.subr.bf16.mxu0 %v1825_v23  ;;  %v1834_v23 = vcombine.low %v536_v15, %v552_v16 }
 0x29b   :  { %1304 = vmatpush1.bf16.msra.mxu1 %v1818_v24  ;;  %1323 = vmatprep.mubr.bf16.mxu1 %v1981_v32  ;;  %v1803_v24 = vcombine.high %v504_v21, %v520_v22 }
 0x29c   :  { %1845 = vmatmul.mubr.msk.bf16.vlgmr.msra.gmra.mxu0 %vm235_vm1, %v2295_v45  ;;  %1305 = vmatprep.subr.bf16.mxu1 %v1787_v26  ;;  %v563_v26 = vshrl.u32 %v562_v4, 7 }
 0x29d   :  { %1427 = vmatpush1.bf16.msra.mxu0 %v1824_v27  ;;  %1446 = vmatprep.mubr.bf16.mxu0 %v1981_v32 }
 0x29e   :  { %1428 = vmatprep.subr.bf16.mxu0 %v1793_v30  ;;  %v2495_v27 = vsub.s32 2, %v563_v26  ;;  %v2500_v29 = vsub.s32 3, %v563_v26  ;;  %v2507_v34 = vsub.s32 0, %v563_v26  ;;  %v2512_v38 = vsub.s32 1, %v563_v26 }
 0x29f   :  { %1306 = vmatpush1.bf16.msra.mxu1 %v1786_v31 }
 0x2a0   :  { %1385 = vmatprep.subr.bf16.mxu1 %v1823_v35  ;;  %v573_v30 = vrot.slane %v554_v28, %v2495_v27  ;;  %v565_v42 = vrot.slane %v554_v28, %v2507_v34  ;;  %v569_v46 = vrot.slane %v554_v28, %v2512_v38 }
 0x2a1   :  { %1429 = vmatpush1.bf16.msra.mxu0 %v1792_v36 }
 0x2a2   :  { %1844 = vmatmul.mubr.msk.bf16.vlgmr.msra.gmra.mxu1 %vm235_vm1, %v2295_v45  ;;  %1508 = vmatprep.subr.bf16.mxu0 %v1829_v39  ;;  %v2514_v39 = vsub.s32 6, %v563_v26 }
 0x2a3   :  { %1386 = vmatpush1.bf16.msra.mxu1 %v1822_v40  ;;  %1405 = vmatprep.mubr.bf16.mxu1 %v1981_v32 }
 0x2a4   :  { %1847 = vmatmul.mubr.msk.bf16.vlgmr.msra.gmra.mxu0 %vm235_vm1, %v2295_v45  ;;  %1387 = vmatprep.subr.bf16.mxu1 %v1791_v43  ;;  %v2517_v43 = vsub.s32 7, %v563_v26  ;;  %v589_v47 = vrot.slane %v554_v28, %v2514_v39 }
 0x2a5   :  { %1509 = vmatpush1.bf16.msra.mxu0 %v1828_v44  ;;  %1528 = vmatprep.mubr.bf16.mxu0 %v1981_v32 }
 0x2a6   :  { %1510 = vmatprep.subr.bf16.mxu0 %v1797_v48  ;;  %v593_v51 = vrot.slane %v554_v28, %v2517_v43 }
 0x2a7   :  { %1388 = vmatpush1.bf16.msra.mxu1 %v1790_v49 }
 0x2a8   :  { %1467 = vmatprep.subr.bf16.mxu1 %v1827_v52  ;;  %v2522_v52 = vsub.s32 4, %v563_v26 }
 0x2a9   :  { %1511 = vmatpush1.bf16.msra.mxu0 %v1796_v53 }
 0x2aa   :  { %1846 = vmatmul.mubr.msk.bf16.vlgmr.msra.gmra.mxu1 %vm235_vm1, %v2295_v45  ;;  %1590 = vmatprep.subr.bf16.mxu0 %v1833_v56  ;;  %v581_v62 = vrot.slane %v554_v28, %v2522_v52 }
 0x2ab   :  { %1468 = vmatpush1.bf16.msra.mxu1 %v1826_v57  ;;  %1487 = vmatprep.mubr.bf16.mxu1 %v1981_v32  ;;  %v2524_v57 = vsub.s32 5, %v563_v26 }
 0x2ac   :  { %1849 = vmatmul.mubr.msk.bf16.vlgmr.msra.gmra.mxu0 %vm235_vm1, %v2295_v45  ;;  %1469 = vmatprep.subr.bf16.mxu1 %v1795_v60  ;;  %v555_v60 = vld [vmem:[%s2574_s10 + $0x8] sm:$0xff] }
 0x2ad   :  { %1591 = vmatpush1.bf16.msra.mxu0 %v1832_v61  ;;  %1610 = vmatprep.mubr.bf16.mxu0 %v1981_v32  ;;  %v605_v2 = vrot.slane %v555_v60, %v2495_v27  ;;  %v609_v7 = vrot.slane %v555_v60, %v2500_v29  ;;  %v597_v15 = vrot.slane %v555_v60, %v2507_v34 }
 0x2ae   :  { %1592 = vmatprep.subr.bf16.mxu0 %v1801_v0 }
 0x2af   :  { %1470 = vmatpush1.bf16.msra.mxu1 %v1794_v1  ;;  %v585_v1 = vrot.slane %v554_v28, %v2524_v57 }
 0x2b0   :  { %1549 = vmatprep.subr.bf16.mxu1 %v1831_v5 }
 0x2b1   :  { %1593 = vmatpush1.bf16.msra.mxu0 %v1800_v6 }
 0x2b2   :  { %1848 = vmatmul.mubr.msk.bf16.vlgmr.msra.gmra.mxu1 %vm235_vm1, %v2295_v45  ;;  %1672 = vmatprep.subr.bf16.mxu0 %v1837_v9 }
 0x2b3   :  { %1550 = vmatpush1.bf16.msra.mxu1 %v1830_v10  ;;  %1569 = vmatprep.mubr.bf16.mxu1 %v1981_v32 }
 0x2b4   :  { %1851 = vmatmul.mubr.msk.bf16.vlgmr.msra.gmra.mxu0 %vm235_vm1, %v2295_v45  ;;  %1551 = vmatprep.subr.bf16.mxu1 %v1799_v13 }
 0x2b5   :  { %1673 = vmatpush1.bf16.msra.mxu0 %v1836_v14  ;;  %1692 = vmatprep.mubr.bf16.mxu0 %v1981_v32 }
 0x2b6   :  { %1674 = vmatprep.subr.bf16.mxu0 %v1805_v17 }
 0x2b7   :  { %1552 = vmatpush1.bf16.msra.mxu1 %v1798_v18  ;;  %v601_v18 = vrot.slane %v555_v60, %v2512_v38 }
 0x2b8   :  { %1631 = vmatprep.subr.bf16.mxu1 %v1835_v19  ;;  %v621_v19 = vrot.slane %v555_v60, %v2514_v39 }
 0x2b9   :  { %1675 = vmatpush1.bf16.msra.mxu0 %v1804_v20 }
 0x2ba   :  { %1850 = vmatmul.mubr.msk.bf16.vlgmr.msra.gmra.mxu1 %vm235_vm1, %v2295_v45 }
 0x2bb   :  { %1632 = vmatpush1.bf16.msra.mxu1 %v1834_v23  ;;  %1651 = vmatprep.mubr.bf16.mxu1 %v1981_v32  ;;  %v1772_v32 = vld [vmem:[%s2576_s12] ss:$0 sm:$0xff]  ;;  %v625_v23 = vrot.slane %v555_v60, %v2517_v43 }
 0x2bc   :  { %1853 = vmatmul.mubr.msk.bf16.vlgmr.msra.gmra.mxu0 %vm235_vm1, %v2295_v45  ;;  %1633 = vmatprep.subr.bf16.mxu1 %v1803_v24 }
 0x2bf   :  { %1634 = vmatpush1.bf16.msra.mxu1 %v1802_v25 }
 0x2c2   :  { %1852 = vmatmul.mubr.msk.bf16.vlgmr.msra.gmra.mxu1 %vm235_vm1, %v2295_v45  ;;  %v577_v45 = vrot.slane %v554_v28, %v2500_v29 }
 0x342   :  { %v484_v31 = vpop.f32.mrf.mxu1 }
 0x343   :  { %v485_v33 = vadd.f32 %v1772_v32, %v484_v31 }
 0x344   :  { %v1936_v35 = vpop.f32.mrf.mxu1  ;;  %v1120_v36 = vpop.f32.mrf.mxu0 }
 0x345   :  { %488 = vst [vmem:[%s2578_s14] sm:$0xff] %v485_v33  ;;  %v1121_v37 = vadd.f32 %v1120_v36, %v573_v30  ;;  %v556_v30 = vld [vmem:[%s2574_s10 + $0x10] sm:$0xff]  ;;  %v613_v33 = vrot.slane %v555_v60, %v2522_v52  ;;  %v617_v36 = vrot.slane %v555_v60, %v2524_v57 }
 0x346   :  { %v1122_v40 = vpop.f32.mrf.mxu0 }
 0x347   :  { %1703 = vst [vmem:[#allocation5 + $0x10] sm:$0xff] %v1121_v37  ;;  %v1123_v41 = vadd.f32 %v1122_v40, %v577_v45  ;;  %v637_v37 = vrot.slane %v556_v30, %v2495_v27 }
 0x348   :  { %v1124_v44 = vpop.f32.mrf.mxu0 }
 0x349   :  { %1704 = vst [vmem:[#allocation5 + $0x18] sm:$0xff] %v1123_v41  ;;  %v641_v44 = vrot.slane %v556_v30, %v2500_v29 }
 0x34a   :  { %v1079_v48 = vpop.f32.mrf.mxu1  ;;  %v1125_v49 = vpop.f32.mrf.mxu0 }
 0x34b   :  { %v1080_v50 = vadd.f32 %v1079_v48, %v565_v42 }
 0x34c   :  { %v1081_v53 = vpop.f32.mrf.mxu1  ;;  %v1202_v54 = vpop.f32.mrf.mxu0 }
 0x34d   :  { %1701 = vst [vmem:[#allocation5] sm:$0xff] %v1080_v50  ;;  %v1082_v55 = vadd.f32 %v1081_v53, %v569_v46  ;;  %v1203_v56 = vadd.f32 %v1202_v54, %v589_v47  ;;  %v629_v54 = vrot.slane %v556_v30, %v2507_v34 }
 0x34e   :  { %v1083_v58 = vpop.f32.mrf.mxu1  ;;  %v1204_v59 = vpop.f32.mrf.mxu0 }
 0x34f   :  { %1702 = vst [vmem:[#allocation5 + $0x8] sm:$0xff] %v1082_v55  ;;  %1707 = vst [vmem:[#allocation5 + $0x30] sm:$0xff] %v1203_v56  ;;  %v1205_v61 = vadd.f32 %v1204_v59, %v593_v51  ;;  %v633_v58 = vrot.slane %v556_v30, %v2512_v38  ;;  %v653_v59 = vrot.slane %v556_v30, %v2514_v39 }
 0x350   :  { %v1084_v63 = vpop.f32.mrf.mxu1  ;;  %v1206_v0 = vpop.f32.mrf.mxu0 }
 0x351   :  { %1708 = vst [vmem:[#allocation5 + $0x38] sm:$0xff] %v1205_v61  ;;  %v657_v63 = vrot.slane %v556_v30, %v2517_v43 }
 0x352   :  { %v1161_v3 = vpop.f32.mrf.mxu1  ;;  %v1207_v5 = vpop.f32.mrf.mxu0 }
 0x353   :  { %v1162_v6 = vadd.f32 %v1161_v3, %v581_v62 }
 0x354   :  { %v1163_v8 = vpop.f32.mrf.mxu1  ;;  %v1284_v9 = vpop.f32.mrf.mxu0 }
 0x355   :  { %1705 = vst [vmem:[#allocation5 + $0x20] sm:$0xff] %v1162_v6  ;;  %v1164_v10 = vadd.f32 %v1163_v8, %v585_v1  ;;  %v1285_v11 = vadd.f32 %v1284_v9, %v605_v2  ;;  %v645_v9 = vrot.slane %v556_v30, %v2522_v52 }
 0x356   :  { %v1165_v12 = vpop.f32.mrf.mxu1  ;;  %v1286_v13 = vpop.f32.mrf.mxu0 }
 0x357   :  { %1706 = vst [vmem:[#allocation5 + $0x28] sm:$0xff] %v1164_v10  ;;  %1711 = vst [vmem:[#allocation5 + $0x50] sm:$0xff] %v1285_v11  ;;  %v1287_v14 = vadd.f32 %v1286_v13, %v609_v7  ;;  %v557_v7 = vld [vmem:[%s2574_s10 + $0x18] sm:$0xff]  ;;  %v649_v12 = vrot.slane %v556_v30, %v2524_v57  ;;  %s1982_s10 = smov [#allocation5]  }
 0x358   :  { %v1166_v16 = vpop.f32.mrf.mxu1  ;;  %v1288_v17 = vpop.f32.mrf.mxu0  ;;  %v669_v13 = vrot.slane %v557_v7, %v2495_v27  ;;  %v665_v27 = vrot.slane %v557_v7, %v2512_v38  ;;  %s1739_s20 = sshll.u32 %s1982_s10, 4  ;;  %s1740_s20 = int_to_ptr.vmem [resolvable:$true] %s1739_s20 }
 0x359   :  { %1712 = vst [vmem:[#allocation5 + $0x58] sm:$0xff] %v1287_v14  ;;  %v673_v17 = vrot.slane %v557_v7, %v2500_v29  ;;  %s1954_s7 = scalar_lea.vmem %s1740_s20, 4096  ;;  %p1959_p6 = scmp.lt.s32.totalorder %s1740_s20, %s1740_s20 }
 0x35a   :  { %v1243_v20 = vpop.f32.mrf.mxu1  ;;  %v1289_v21 = vpop.f32.mrf.mxu0  ;;  %p1955_p5 = scmp.ne.s32.totalorder %s1740_s20, %s1954_s7  ;;  %p1960_p7 = scmp.lt.s32.totalorder %s1954_s7, %s1954_s7 }
 0x35b   :  { %v1244_v22 = vadd.f32 %v1243_v20, %v597_v15 }
 0x35c   :  { %v1245_v24 = vpop.f32.mrf.mxu1  ;;  %v1366_v25 = vpop.f32.mrf.mxu0  ;;  %p1961_p8 = por %p1960_p7, %p1959_p6 }
 0x35d   :  { %1709 = vst [vmem:[#allocation5 + $0x40] sm:$0xff] %v1244_v22  ;;  %v1246_v4 = vadd.f32 %v1245_v24, %v601_v18  ;;  %v1367_v26 = vadd.f32 %v1366_v25, %v621_v19  ;;  %v661_v25 = vrot.slane %v557_v7, %v2507_v34 }
 0x35e   :  { %v1247_v28 = vpop.f32.mrf.mxu1  ;;  %v1368_v32 = vpop.f32.mrf.mxu0  ;;  %p1962_p9 = pnand %p1961_p8, %p1955_p5 }
 0x35f   :  { %1710 = vst [vmem:[#allocation5 + $0x48] sm:$0xff] %v1246_v4  ;;  %1715 = vst [vmem:[#allocation5 + $0x70] sm:$0xff] %v1367_v26  ;;  %v1369_v31 = vadd.f32 %v1368_v32, %v625_v23  ;;  %v685_v28 = vrot.slane %v557_v7, %v2514_v39  ;;  %v681_v39 = vrot.slane %v557_v7, %v2524_v57 }
 0x360   :  { %v1248_v45 = vpop.f32.mrf.mxu1  ;;  %v1370_v35 = vpop.f32.mrf.mxu0 }
 0x361   :  { %1716 = vst [vmem:[#allocation5 + $0x78] sm:$0xff] %v1369_v31  ;;  %v689_v31 = vrot.slane %v557_v7, %v2517_v43 }
 0x362   :  { %v1325_v40 = vpop.f32.mrf.mxu1  ;;  %v1371_v41 = vpop.f32.mrf.mxu0 }
 0x363   :  { %v1326_v42 = vadd.f32 %v1325_v40, %v613_v33  ;;  %v677_v41 = vrot.slane %v557_v7, %v2522_v52 }
 0x364   :  { %v1327_v46 = vpop.f32.mrf.mxu1  ;;  %v1448_v47 = vpop.f32.mrf.mxu0 }
 0x365   :  { %1713 = vst [vmem:[#allocation5 + $0x60] sm:$0xff] %v1326_v42  ;;  %v1328_v48 = vadd.f32 %v1327_v46, %v617_v36  ;;  %v1449_v49 = vadd.f32 %v1448_v47, %v637_v37 }
 0x366   :  { %v1329_v50 = vpop.f32.mrf.mxu1  ;;  %v1450_v51 = vpop.f32.mrf.mxu0 }
 0x367   :  { %1714 = vst [vmem:[#allocation5 + $0x68] sm:$0xff] %v1328_v48  ;;  %1719 = vst [vmem:[#allocation5 + $0x90] sm:$0xff] %v1449_v49  ;;  %v1451_v53 = vadd.f32 %v1450_v51, %v641_v44 }
 0x368   :  { %v1330_v55 = vpop.f32.mrf.mxu1  ;;  %v1452_v56 = vpop.f32.mrf.mxu0 }
 0x369   :  { %1720 = vst [vmem:[#allocation5 + $0x98] sm:$0xff] %v1451_v53 }
 0x36a   :  { %v1407_v60 = vpop.f32.mrf.mxu1  ;;  %v1453_v61 = vpop.f32.mrf.mxu0 }
 0x36b   :  { %v1408_v62 = vadd.f32 %v1407_v60, %v629_v54 }
 0x36c   :  { %v1409_v0 = vpop.f32.mrf.mxu1  ;;  %v1530_v1 = vpop.f32.mrf.mxu0 }
 0x36d   :  { %1717 = vst [vmem:[#allocation5 + $0x80] sm:$0xff] %v1408_v62  ;;  %v1410_v2 = vadd.f32 %v1409_v0, %v633_v58  ;;  %v1531_v3 = vadd.f32 %v1530_v1, %v653_v59 }
 0x36e   :  { %v1411_v5 = vpop.f32.mrf.mxu1  ;;  %v1532_v6 = vpop.f32.mrf.mxu0 }
 0x36f   :  { %1718 = vst [vmem:[#allocation5 + $0x88] sm:$0xff] %v1410_v2  ;;  %1723 = vst [vmem:[#allocation5 + $0xb0] sm:$0xff] %v1531_v3  ;;  %v1533_v8 = vadd.f32 %v1532_v6, %v657_v63 }
 0x370   :  { %v1412_v10 = vpop.f32.mrf.mxu1  ;;  %v1534_v11 = vpop.f32.mrf.mxu0 }
 0x371   :  { %1724 = vst [vmem:[#allocation5 + $0xb8] sm:$0xff] %v1533_v8 }
 0x372   :  { %v1489_v14 = vpop.f32.mrf.mxu1  ;;  %v1535_v15 = vpop.f32.mrf.mxu0 }
 0x373   :  { %v1490_v16 = vadd.f32 %v1489_v14, %v645_v9 }
 0x374   :  { %v1491_v18 = vpop.f32.mrf.mxu1  ;;  %v1612_v19 = vpop.f32.mrf.mxu0 }
 0x375   :  { %1721 = vst [vmem:[#allocation5 + $0xa0] sm:$0xff] %v1490_v16  ;;  %v1492_v20 = vadd.f32 %v1491_v18, %v649_v12  ;;  %v1613_v21 = vadd.f32 %v1612_v19, %v669_v13 }
 0x376   :  { %v1493_v22 = vpop.f32.mrf.mxu1  ;;  %v1614_v23 = vpop.f32.mrf.mxu0 }
 0x377   :  { %1722 = vst [vmem:[#allocation5 + $0xa8] sm:$0xff] %v1492_v20  ;;  %1727 = vst [vmem:[#allocation5 + $0xd0] sm:$0xff] %v1613_v21  ;;  %v1615_v24 = vadd.f32 %v1614_v23, %v673_v17 }
 0x378   :  { %v1494_v4 = vpop.f32.mrf.mxu1  ;;  %v1616_v26 = vpop.f32.mrf.mxu0 }
 0x379   :  { %1728 = vst [vmem:[#allocation5 + $0xd8] sm:$0xff] %v1615_v24 }
 0x37a   :  { %v1571_v29 = vpop.f32.mrf.mxu1  ;;  %v1617_v32 = vpop.f32.mrf.mxu0 }
 0x37b   :  { %v1572_v30 = vadd.f32 %v1571_v29, %v661_v25 }
 0x37c   :  { %v1573_v33 = vpop.f32.mrf.mxu1  ;;  %v1694_v45 = vpop.f32.mrf.mxu0 }
 0x37d   :  { %1725 = vst [vmem:[#allocation5 + $0xc0] sm:$0xff] %v1572_v30  ;;  %v1574_v35 = vadd.f32 %v1573_v33, %v665_v27  ;;  %v1695_v36 = vadd.f32 %v1694_v45, %v685_v28 }
 0x37e   :  { %v1575_v37 = vpop.f32.mrf.mxu1  ;;  %v1696_v40 = vpop.f32.mrf.mxu0 }
 0x37f   :  { %1726 = vst [vmem:[#allocation5 + $0xc8] sm:$0xff] %v1574_v35  ;;  %1731 = vst [vmem:[#allocation5 + $0xf0] sm:$0xff] %v1695_v36  ;;  %v1697_v34 = vadd.f32 %v1696_v40, %v689_v31 }
 0x380   :  { %v1576_v38 = vpop.f32.mrf.mxu1  ;;  %v1698_v42 = vpop.f32.mrf.mxu0 }
 0x381   :  { %1732 = vst [vmem:[#allocation5 + $0xf8] sm:$0xff] %v1697_v34 }
 0x382   :  { %v1653_v44 = vpop.f32.mrf.mxu1  ;;  %v1699_v46 = vpop.f32.mrf.mxu0 }
 0x383   :  { %v1654_v43 = vadd.f32 %v1653_v44, %v677_v41 }
 0x384   :  { %v1655_v47 = vpop.f32.mrf.mxu1 }
 0x385   :  { %1729 = vst [vmem:[#allocation5 + $0xe0] sm:$0xff] %v1654_v43  ;;  %v1656_v48 = vadd.f32 %v1655_v47, %v681_v39 }
 0x386   :  { %v1657_v49 = vpop.f32.mrf.mxu1 }
 0x387   :  { %1730 = vst [vmem:[#allocation5 + $0xe8] sm:$0xff] %v1656_v48 }
 0x388   :  { %v1658_v50 = vpop.f32.mrf.mxu1 }
 0x389   :  { %1965 = shalt.err (!%p1962_p9)
}
 0x38a   :  { %1742 = dma.vmem_to_hbm [thread:$0]  %s1740_s20, 4096, %s2577_s13, [#allocation3]  }
 0x38b   :  { %1976 = dma.done.wait [#allocation3], 4096  }
 0x38c   :  { %1977 = vsyncadd [#allocation3], 4294963200 }
 0x38d   :  { %1750 = vsyncpa [#allocation3], 1 }
 0x38e   :  { %1751 = vsyncpa [#allocation4], 1 }

</bundles_post_ra>
